<compile_context>
chip_gen: v5e
topology: v5e:2x2
jax: 0.10.0
libtpu: 0.0.40
codegen_flags: <defaults>
</compile_context>

<pallas_src>
import functools

import jax
import jax.numpy as jnp
from jax.experimental import pallas as pl
from jax.experimental.pallas import tpu as pltpu


def _round_up(x: int, m: int) -> int:
    return ((x + m - 1) // m) * m


def _slate_kernel(state_ref, act_ref, w1s_ref, w1a_ref, b1_ref, w2_ref, b2_ref,
                  out_ref, *, apply_sigmoid: bool):
    # First layer: two MXU matmuls accumulated in f32 (no activation concat).
    h = jnp.dot(state_ref[...], w1s_ref[...], preferred_element_type=jnp.float32)
    h = h + jnp.dot(act_ref[...], w1a_ref[...], preferred_element_type=jnp.float32)
    h = h + b1_ref[...]              # (1, H) broadcast over the (TM, H) tile
    h = jnp.maximum(h, 0.0)          # ReLU on the VPU, in f32

    # Second layer: 1-wide projection on VPU (mul) + XLU (lane reduce) instead
    # of a pathological (H, 1) MXU matmul. b2 comes in as an SMEM scalar.
    y = jnp.sum(h * w2_ref[...], axis=-1) + b2_ref[0]          # (TM,)
    if apply_sigmoid:                # static Python flag
        y = jax.nn.sigmoid(y)        # EUP exp/recip, essentially free when fused

    # Lane-dense store: TM values across lanes of a single output row.
    out_ref[...] = y.reshape(1, 1, -1).astype(out_ref.dtype)


def slate_reward_predictor(state, action_onehot, w1, b1, w2, b2, *,
                           reward_type: str = "binary"):
    """Pallas forward pass matching SlateRewardPredictor.forward.

    state:         (N, dim_context)
    action_onehot: (N, slate_size, n_unique_actions) -- flattened like torch
    w1: (H, dim_context + slate_size*n_unique_actions), b1: (H,)   (fc1, torch layout)
    w2: (1, H), b2: (1,)                                           (fc2, torch layout)
    """
    n, dim_context = state.shape
    action = action_onehot.reshape(n, -1)
    a_dim = action.shape[1]
    hidden = w1.shape[0]
    assert w1.shape[1] == dim_context + a_dim

    dtype = jnp.float32
    state = state.astype(dtype)
    action = action.astype(dtype)

    # Split fc1 weight into state / action column blocks; transpose so the
    # kernel computes plain x @ W (no in-kernel transposes).
    w1_s = w1[:, :dim_context].T.astype(dtype)      # (dim_context, H)
    w1_a = w1[:, dim_context:].T.astype(dtype)      # (A, H)

    # Pad feature dims to lane multiples; pick a 128..512-row batch tile.
    ds_p = _round_up(dim_context, 128)
    da_p = _round_up(a_dim, 128)
    h_p = _round_up(hidden, 128)
    tm = min(512, _round_up(max(n, 1), 128))
    # Keep the double-buffered activation tiles well inside the v7x scoped
    # VMEM budget (resident weights are small here).
    bytes_per_row = 4 * (ds_p + da_p + h_p)
    while tm > 128 and 2 * 2 * tm * bytes_per_row > 24 * 1024 * 1024:
        tm -= 128
    n_p = _round_up(n, tm)
    grid = n_p // tm

    def pad2(x, r, c):
        return jnp.pad(x, ((0, r - x.shape[0]), (0, c - x.shape[1])))

    state_p = pad2(state, n_p, ds_p)
    act_p = pad2(action, n_p, da_p)
    w1s_p = pad2(w1_s, ds_p, h_p)
    w1a_p = pad2(w1_a, da_p, h_p)
    b1_p = pad2(b1.reshape(1, -1).astype(dtype), 1, h_p)
    w2_p = pad2(w2.reshape(1, -1).astype(dtype), 1, h_p)
    b2_s = b2.reshape(1).astype(dtype)               # (1,) scalar -> SMEM

    kernel = functools.partial(_slate_kernel,
                               apply_sigmoid=(reward_type == "binary"))

    grid_spec = pltpu.PrefetchScalarGridSpec(
        num_scalar_prefetch=0,
        grid=(grid,),
        in_specs=[
            pl.BlockSpec((tm, ds_p), lambda i: (i, 0)),          # state tile
            pl.BlockSpec((tm, da_p), lambda i: (i, 0)),          # action tile
            pl.BlockSpec((ds_p, h_p), lambda i: (0, 0)),         # W1_s (resident)
            pl.BlockSpec((da_p, h_p), lambda i: (0, 0)),         # W1_a (resident)
            pl.BlockSpec((1, h_p), lambda i: (0, 0)),            # b1   (resident)
            pl.BlockSpec((1, h_p), lambda i: (0, 0)),            # w2   (resident)
            pl.BlockSpec(memory_space=pltpu.MemorySpace.SMEM),   # b2 scalar
        ],
        out_specs=pl.BlockSpec((1, 1, tm), lambda i: (i, 0, 0)),
    )

    out = pl.pallas_call(
        kernel,
        out_shape=jax.ShapeDtypeStruct((grid, 1, tm), dtype),
        grid_spec=grid_spec,
        compiler_params=pltpu.CompilerParams(
            dimension_semantics=("parallel",)),
    )(state_p, act_p, w1s_p, w1a_p, b1_p, w2_p, b2_s)

    y = out.reshape(-1)[:n]
    # Match torch's .squeeze(): (N,) for N > 1, scalar for N == 1.
    return jnp.squeeze(y)


if __name__ == "__main__":
    key = jax.random.PRNGKey(0)
    k1, k2, k3, k4, k5, k6 = jax.random.split(key, 6)

    # Small shapes consistent with the module.
    n_rounds = 8
    dim_context = 10
    slate_size = 3
    n_unique_actions = 4
    hidden_dim = 32
    reward_type = "binary"
    d_in = dim_context + slate_size * n_unique_actions

    state = jax.random.normal(k1, (n_rounds, dim_context), dtype=jnp.float32)
    action_idx = jax.random.randint(k2, (n_rounds, slate_size), 0, n_unique_actions)
    action_onehot = jax.nn.one_hot(action_idx, n_unique_actions, dtype=jnp.float32)

    # fc1 / fc2 parameters (PyTorch nn.Linear layout).
    w1 = 0.1 * jax.random.normal(k3, (hidden_dim, d_in), dtype=jnp.float32)
    b1 = 0.1 * jax.random.normal(k4, (hidden_dim,), dtype=jnp.float32)
    w2 = 0.1 * jax.random.normal(k5, (1, hidden_dim), dtype=jnp.float32)
    b2 = 0.1 * jax.random.normal(k6, (1,), dtype=jnp.float32)

    out = slate_reward_predictor(state, action_onehot, w1, b1, w2, b2,
                                 reward_type=reward_type)
    out = jax.block_until_ready(out)

    # Plain-JAX reference mirroring the PyTorch forward exactly.
    inp = jnp.concatenate([state, action_onehot.reshape(n_rounds, -1)], axis=1)
    h_ref = jnp.maximum(inp @ w1.T + b1, 0.0)
    y_ref = h_ref @ w2.T + b2
    if reward_type == "binary":
        y_ref = jax.nn.sigmoid(y_ref)
    y_ref = jnp.squeeze(y_ref)

    assert out.shape == y_ref.shape, (out.shape, y_ref.shape)
    assert jnp.allclose(out, y_ref, atol=1e-5, rtol=1e-5), (out, y_ref)
    print("KERNEL_OK")
</pallas_src>

<mosaic_0001>
module attributes {stable_mosaic.version = 11 : i64} {
  func.func @_slate_kernel(%arg0: i32, %arg1: memref<128x128xf32, #tpu.memory_space<vmem>>, %arg2: memref<128x128xf32, #tpu.memory_space<vmem>>, %arg3: memref<128x128xf32, #tpu.memory_space<vmem>>, %arg4: memref<128x128xf32, #tpu.memory_space<vmem>>, %arg5: memref<1x128xf32, #tpu.memory_space<vmem>>, %arg6: memref<1x128xf32, #tpu.memory_space<vmem>>, %arg7: memref<1xf32, #tpu.memory_space<smem>>, %arg8: memref<1x1x128xf32, #tpu.memory_space<vmem>>) attributes {dimension_semantics = [#tpu.dimension_semantics<parallel>], iteration_bounds = array<i64: 1>, scalar_prefetch = 0 : i64, scratch_operands = 0 : i64, tpu.core_type = #tpu.core_type<tc>, window_params = [{transform_indices = @transform_0, window_bounds = array<i64: 128, 128>}, {transform_indices = @transform_1, window_bounds = array<i64: 128, 128>}, {pipeline_mode = #tpu.pipeline_mode<synchronous>, transform_indices = @transform_2, window_bounds = array<i64: 128, 128>}, {pipeline_mode = #tpu.pipeline_mode<synchronous>, transform_indices = @transform_3, window_bounds = array<i64: 128, 128>}, {pipeline_mode = #tpu.pipeline_mode<synchronous>, transform_indices = @transform_4, window_bounds = array<i64: 1, 128>}, {pipeline_mode = #tpu.pipeline_mode<synchronous>, transform_indices = @transform_5, window_bounds = array<i64: 1, 128>}, {transform_indices = @transform_6, window_bounds = array<i64: 1>}, {transform_indices = @transform_7, window_bounds = array<i64: 1, 1, 128>}]} {
    %c0 = arith.constant 0 : index
    %c0_0 = arith.constant 0 : index
    %0 = vector.load %arg1[%c0, %c0_0] : memref<128x128xf32, #tpu.memory_space<vmem>>, vector<128x128xf32>
    %c0_1 = arith.constant 0 : index
    %c0_2 = arith.constant 0 : index
    %1 = vector.load %arg3[%c0_1, %c0_2] : memref<128x128xf32, #tpu.memory_space<vmem>>, vector<128x128xf32>
    %cst = arith.constant dense<0.000000e+00> : vector<128x128xf32>
    %2 = tpu.matmul %0, %1, %cst {dimension_numbers = #tpu.dot_dimension_numbers<[1], [0], [0], [1], [0, 0, 1, 1], [], []>} : vector<128x128xf32>, vector<128x128xf32>, vector<128x128xf32> -> vector<128x128xf32>
    %c0_3 = arith.constant 0 : index
    %c0_4 = arith.constant 0 : index
    %3 = vector.load %arg2[%c0_3, %c0_4] : memref<128x128xf32, #tpu.memory_space<vmem>>, vector<128x128xf32>
    %c0_5 = arith.constant 0 : index
    %c0_6 = arith.constant 0 : index
    %4 = vector.load %arg4[%c0_5, %c0_6] : memref<128x128xf32, #tpu.memory_space<vmem>>, vector<128x128xf32>
    %cst_7 = arith.constant dense<0.000000e+00> : vector<128x128xf32>
    %5 = tpu.matmul %3, %4, %cst_7 {dimension_numbers = #tpu.dot_dimension_numbers<[1], [0], [0], [1], [0, 0, 1, 1], [], []>} : vector<128x128xf32>, vector<128x128xf32>, vector<128x128xf32> -> vector<128x128xf32>
    %6 = arith.addf %2, %5 : vector<128x128xf32>
    %c0_8 = arith.constant 0 : index
    %c0_9 = arith.constant 0 : index
    %7 = vector.load %arg5[%c0_8, %c0_9] : memref<1x128xf32, #tpu.memory_space<vmem>>, vector<1x128xf32>
    %8 = vector.broadcast %7 : vector<1x128xf32> to vector<128x128xf32>
    %9 = arith.addf %6, %8 : vector<128x128xf32>
    %cst_10 = arith.constant 0.000000e+00 : f32
    %10 = vector.broadcast %cst_10 : f32 to vector<128x128xf32>
    %11 = arith.maximumf %9, %10 : vector<128x128xf32>
    %c0_11 = arith.constant 0 : index
    %c0_12 = arith.constant 0 : index
    %12 = vector.load %arg6[%c0_11, %c0_12] : memref<1x128xf32, #tpu.memory_space<vmem>>, vector<1x128xf32>
    %13 = vector.broadcast %12 : vector<1x128xf32> to vector<128x128xf32>
    %14 = arith.mulf %11, %13 : vector<128x128xf32>
    %cst_13 = arith.constant dense<0.000000e+00> : vector<128xf32>
    %15 = vector.multi_reduction <add>, %14, %cst_13 [1] : vector<128x128xf32> to vector<128xf32>
    %c0_14 = arith.constant 0 : index
    %16 = memref.load %arg7[%c0_14] : memref<1xf32, #tpu.memory_space<smem>>
    %17 = vector.broadcast %16 : f32 to vector<128xf32>
    %18 = arith.addf %15, %17 : vector<128xf32>
    %19 = arith.negf %18 : vector<128xf32>
    %20 = math.exp %19 : vector<128xf32>
    %cst_15 = arith.constant 1.000000e+00 : f32
    %21 = vector.broadcast %cst_15 : f32 to vector<128xf32>
    %22 = arith.addf %21, %20 : vector<128xf32>
    %23 = arith.divf %21, %22 : vector<128xf32>
    %24 = vector.shape_cast %23 : vector<128xf32> to vector<1x1x128xf32>
    %c0_16 = arith.constant 0 : index
    %c0_17 = arith.constant 0 : index
    %c0_18 = arith.constant 0 : index
    %25 = vector.load %arg8[%c0_16, %c0_17, %c0_18] : memref<1x1x128xf32, #tpu.memory_space<vmem>>, vector<1x1x128xf32>
    tpu.vector_store %arg8[%c0_16, %c0_17, %c0_18], %24 {strides = array<i32>} : memref<1x1x128xf32, #tpu.memory_space<vmem>>, vector<1x1x128xf32>,
    return
  }
  func.func @transform_0(%arg0: i32) -> (i32, i32) {
    %c0_i32 = arith.constant 0 : i32
    %c0_i32_0 = arith.constant 0 : i32
    return %arg0, %c0_i32 : i32, i32
  }
  func.func @transform_1(%arg0: i32) -> (i32, i32) {
    %c0_i32 = arith.constant 0 : i32
    %c0_i32_0 = arith.constant 0 : i32
    return %arg0, %c0_i32 : i32, i32
  }
  func.func @transform_2(%arg0: i32) -> (i32, i32) {
    %c0_i32 = arith.constant 0 : i32
    %c0_i32_0 = arith.constant 0 : i32
    %c0_i32_1 = arith.constant 0 : i32
    return %c0_i32, %c0_i32_0 : i32, i32
  }
  func.func @transform_3(%arg0: i32) -> (i32, i32) {
    %c0_i32 = arith.constant 0 : i32
    %c0_i32_0 = arith.constant 0 : i32
    %c0_i32_1 = arith.constant 0 : i32
    return %c0_i32, %c0_i32_0 : i32, i32
  }
  func.func @transform_4(%arg0: i32) -> (i32, i32) {
    %c0_i32 = arith.constant 0 : i32
    %c0_i32_0 = arith.constant 0 : i32
    %c0_i32_1 = arith.constant 0 : i32
    return %c0_i32, %c0_i32_0 : i32, i32
  }
  func.func @transform_5(%arg0: i32) -> (i32, i32) {
    %c0_i32 = arith.constant 0 : i32
    %c0_i32_0 = arith.constant 0 : i32
    %c0_i32_1 = arith.constant 0 : i32
    return %c0_i32, %c0_i32_0 : i32, i32
  }
  func.func @transform_6(%arg0: i32) -> i32 {
    %c0_i32 = arith.constant 0 : i32
    %c0_i32_0 = arith.constant 0 : i32
    return %c0_i32 : i32
  }
  func.func @transform_7(%arg0: i32) -> (i32, i32, i32) {
    %c0_i32 = arith.constant 0 : i32
    %c0_i32_0 = arith.constant 0 : i32
    %c0_i32_1 = arith.constant 0 : i32
    return %arg0, %c0_i32, %c0_i32_0 : i32, i32, i32
  }
}

</mosaic_0001>

<bundles_post_ra>
// kernel: tpu_custom_call.1
= control target key start
LH: loop header
LB: loop body
LE: loop exit
PB: predicated region body
PF: predicated region fallthrough
CT: control target
= control target key end

     0   :  { %13 = vsyncpa [#allocation4], 0  ;;  %s1608_s0 = inlined_call_operand.hbm [shape: f32[128,128], index: 0, kind: input, shape index: {}]   ;;  %s1609_s1 = inlined_call_operand.hbm [shape: f32[128,128], index: 1, kind: input, shape index: {}]   ;;  %s1610_s2 = inlined_call_operand.hbm [shape: f32[128,128], index: 2, kind: input, shape index: {}]   ;;  %s1611_s3 = inlined_call_operand.hbm [shape: f32[128,128], index: 3, kind: input, shape index: {}]   ;;  %s1612_s4 = inlined_call_operand.vmem [shape: f32[1,128], index: 4, kind: input, shape index: {}]   ;;  %s1613_s5 = inlined_call_operand.vmem [shape: f32[1,128], index: 5, kind: input, shape index: {}]   ;;  %s1614_s6 = inlined_call_operand.<no memory space> [shape: f32[1], index: 6, kind: input, shape index: {}]   ;;  %s1615_s7 = inlined_call_operand.hbm [shape: f32[1,1,128], index: 7, kind: output, shape index: {}]  }
   0x1   :  { %14 = vsyncpa [#allocation7], 0 }
   0x2   :  { %15 = vsyncpa [#allocation10], 0 }
   0x3   :  { %16 = vsyncpa [#allocation5], 0  ;;  %s34_s26 = sshll.u32 %s1609_s1, 4  ;;  %s1044_s27 = smov [#allocation6]   ;;  %s35_s26 = int_to_ptr.hbm [resolvable:$true] %s34_s26 }
   0x4   :  { %s36_s28 = sshll.u32 %s1044_s27, 4  ;;  %s21_s8 = sshll.u32 %s1608_s0, 4  ;;  %s37_s28 = int_to_ptr.vmem [resolvable:$true] %s36_s28  ;;  %s22_s8 = int_to_ptr.hbm [resolvable:$true] %s21_s8 }
   0x5   :  { %s1045_s9 = smov 128   ;;  %s1046_s10 = smov 8  }
   0x6   :  { %42 = dma.hbm_to_vmem [thread:$0]  %s35_s26, 2048, %s37_s28, [#allocation7], %s1045_s9, %s1045_s9, %s1046_s10  }
   0x7   :  { %s1047_s11 = smov [#allocation3]   ;;  %s47_s15 = sshll.u32 %s1610_s2, 4  ;;  %s48_s15 = int_to_ptr.hbm [resolvable:$true] %s47_s15 }
   0x8   :  { %s23_s12 = sshll.u32 %s1047_s11, 4  ;;  %s60_s17 = sshll.u32 %s1611_s3, 4  ;;  %s24_s12 = int_to_ptr.vmem [resolvable:$true] %s23_s12  ;;  %s61_s17 = int_to_ptr.hbm [resolvable:$true] %s60_s17 }
   0x9   :  { %29 = dma.hbm_to_vmem [thread:$0]  %s22_s8, 2048, %s24_s12, [#allocation4], %s1045_s9, %s1045_s9, %s1046_s10  }
   0xa   :  { %s1048_s18 = smov [#allocation8]   ;;  %s1049_s0 = smov [#allocation9]  }
   0xb   :  { %s49_s19 = sshll.u32 %s1048_s18, 4  ;;  %s62_s20 = sshll.u32 %s1049_s0, 4  ;;  %s50_s19 = int_to_ptr.vmem [resolvable:$true] %s49_s19  ;;  %s63_s20 = int_to_ptr.vmem [resolvable:$true] %s62_s20 }
   0xc   :  { %55 = dma.hbm_to_vmem [thread:$0]  %s48_s15, 2048, %s50_s19, [#allocation7], %s1045_s9, %s1045_s9, %s1046_s10  }
   0xd   :  { %68 = dma.hbm_to_vmem [thread:$0]  %s61_s17, 2048, %s63_s20, [#allocation10], %s1045_s9, %s1045_s9, %s1046_s10  }
   0xe   :  { %1036 = dma.done.wait [#allocation4], 2048  }
   0xf   :  { %1037 = vsyncadd [#allocation4], 4294965248 }
  0x10   :  { %1038 = dma.done.wait [#allocation7], 4096  }
  0x11   :  { %1039 = vsyncadd [#allocation7], 4294963200 }
  0x12   :  { %1040 = dma.done.wait [#allocation10], 2048  }
  0x13   :  { %1041 = vsyncadd [#allocation10], 4294965248  ;;  %v154_v0 = vld [vmem:[#allocation9 + $0x78] sm:$0xff]  ;;  %v153_v2 = vld [vmem:[#allocation9 + $0x70] sm:$0xff]  ;;  %vm716_vm12 = vcmask 130112   ;;  %s783_s26 = sshll.u32 %s1615_s7, 4  ;;  %s784_s26 = int_to_ptr.hbm [resolvable:$true] %s783_s26 }
  0x14   :  { %v122_v1 = vld [vmem:[#allocation8 + $0x78] sm:$0xff]  ;;  %155 = vmatpush.msra.mxu0 %v154_v0  ;;  %811 = vmatpush.msra.mxu2 %v154_v0  ;;  %v121_v3 = vld [vmem:[#allocation8 + $0x70] sm:$0xff]  ;;  %v152_v4 = vld [vmem:[#allocation9 + $0x68] sm:$0xff] }
  0x15   :  { %220 = vmatpush.msra.mxu1 %v122_v1  ;;  %827 = vmatpush.msra.mxu3 %v122_v1  ;;  %v120_v5 = vld [vmem:[#allocation8 + $0x68] sm:$0xff]  ;;  %v151_v6 = vld [vmem:[#allocation9 + $0x60] sm:$0xff]  ;;  %v150_v8 = vld [vmem:[#allocation9 + $0x58] sm:$0xff] }
  0x16   :  { %156 = vmatpush.msra.mxu0 %v153_v2  ;;  %812 = vmatpush.msra.mxu2 %v153_v2  ;;  %v119_v7 = vld [vmem:[#allocation8 + $0x60] sm:$0xff]  ;;  %v118_v9 = vld [vmem:[#allocation8 + $0x58] sm:$0xff]  ;;  %v149_v10 = vld [vmem:[#allocation9 + $0x50] sm:$0xff] }
  0x17   :  { %221 = vmatpush.msra.mxu1 %v121_v3  ;;  %828 = vmatpush.msra.mxu3 %v121_v3  ;;  %v117_v11 = vld [vmem:[#allocation8 + $0x50] sm:$0xff]  ;;  %v148_v12 = vld [vmem:[#allocation9 + $0x48] sm:$0xff]  ;;  %v147_v14 = vld [vmem:[#allocation9 + $0x40] sm:$0xff] }
  0x18   :  { %157 = vmatpush.msra.mxu0 %v152_v4  ;;  %813 = vmatpush.msra.mxu2 %v152_v4  ;;  %v116_v13 = vld [vmem:[#allocation8 + $0x48] sm:$0xff]  ;;  %v115_v15 = vld [vmem:[#allocation8 + $0x40] sm:$0xff]  ;;  %v146_v16 = vld [vmem:[#allocation9 + $0x38] sm:$0xff] }
  0x19   :  { %222 = vmatpush.msra.mxu1 %v120_v5  ;;  %829 = vmatpush.msra.mxu3 %v120_v5  ;;  %v114_v17 = vld [vmem:[#allocation8 + $0x38] sm:$0xff]  ;;  %v145_v18 = vld [vmem:[#allocation9 + $0x30] sm:$0xff]  ;;  %v144_v20 = vld [vmem:[#allocation9 + $0x28] sm:$0xff] }
  0x1a   :  { %158 = vmatpush.msra.mxu0 %v151_v6  ;;  %814 = vmatpush.msra.mxu2 %v151_v6  ;;  %v113_v19 = vld [vmem:[#allocation8 + $0x30] sm:$0xff]  ;;  %v112_v21 = vld [vmem:[#allocation8 + $0x28] sm:$0xff]  ;;  %v143_v22 = vld [vmem:[#allocation9 + $0x20] sm:$0xff] }
  0x1b   :  { %223 = vmatpush.msra.mxu1 %v119_v7  ;;  %830 = vmatpush.msra.mxu3 %v119_v7  ;;  %v111_v23 = vld [vmem:[#allocation8 + $0x20] sm:$0xff]  ;;  %v142_v24 = vld [vmem:[#allocation9 + $0x18] sm:$0xff]  ;;  %v141_v26 = vld [vmem:[#allocation9 + $0x10] sm:$0xff] }
  0x1c   :  { %159 = vmatpush.msra.mxu0 %v150_v8  ;;  %815 = vmatpush.msra.mxu2 %v150_v8  ;;  %v110_v25 = vld [vmem:[#allocation8 + $0x18] sm:$0xff]  ;;  %v109_v27 = vld [vmem:[#allocation8 + $0x10] sm:$0xff]  ;;  %v140_v28 = vld [vmem:[#allocation9 + $0x8] sm:$0xff] }
  0x1d   :  { %224 = vmatpush.msra.mxu1 %v118_v9  ;;  %831 = vmatpush.msra.mxu3 %v118_v9  ;;  %v108_v29 = vld [vmem:[#allocation8 + $0x8] sm:$0xff]  ;;  %v139_v30 = vld [vmem:[#allocation9] sm:$0xff]  ;;  %v125_v40 = vld [vmem:[#allocation6 + $0x10] sm:$0xff] }
  0x1e   :  { %160 = vmatpush.msra.mxu0 %v149_v10  ;;  %816 = vmatpush.msra.mxu2 %v149_v10  ;;  %v107_v31 = vld [vmem:[#allocation8] sm:$0xff]  ;;  %v124_v36 = vld [vmem:[#allocation6 + $0x8] sm:$0xff]  ;;  %v133_v41 = vld [vmem:[#allocation6 + $0x50] sm:$0xff] }
  0x1f   :  { %225 = vmatpush.msra.mxu1 %v117_v11  ;;  %832 = vmatpush.msra.mxu3 %v117_v11  ;;  %v123_v32 = vld [vmem:[#allocation6] sm:$0xff]  ;;  %v132_v37 = vld [vmem:[#allocation6 + $0x48] sm:$0xff]  ;;  %v93_v42 = vld [vmem:[#allocation3 + $0x10] sm:$0xff] }
  0x20   :  { %161 = vmatpush.msra.mxu0 %v148_v12  ;;  %817 = vmatpush.msra.mxu2 %v148_v12  ;;  %v131_v33 = vld [vmem:[#allocation6 + $0x40] sm:$0xff]  ;;  %v92_v38 = vld [vmem:[#allocation3 + $0x8] sm:$0xff]  ;;  %v101_v43 = vld [vmem:[#allocation3 + $0x50] sm:$0xff] }
  0x21   :  { %226 = vmatpush.msra.mxu1 %v116_v13  ;;  %833 = vmatpush.msra.mxu3 %v116_v13  ;;  %v91_v34 = vld [vmem:[#allocation3] sm:$0xff]  ;;  %v100_v39 = vld [vmem:[#allocation3 + $0x48] sm:$0xff]  ;;  %v126_v44 = vld [vmem:[#allocation6 + $0x18] sm:$0xff] }
  0x22   :  { %162 = vmatpush.msra.mxu0 %v147_v14  ;;  %818 = vmatpush.msra.mxu2 %v147_v14  ;;  %v99_v35 = vld [vmem:[#allocation3 + $0x40] sm:$0xff]  ;;  %v134_v45 = vld [vmem:[#allocation6 + $0x58] sm:$0xff]  ;;  %v128_v52 = vld [vmem:[#allocation6 + $0x28] sm:$0xff] }
  0x23   :  { %227 = vmatpush.msra.mxu1 %v115_v15  ;;  %834 = vmatpush.msra.mxu3 %v115_v15  ;;  %v94_v46 = vld [vmem:[#allocation3 + $0x18] sm:$0xff]  ;;  %v127_v48 = vld [vmem:[#allocation6 + $0x20] sm:$0xff]  ;;  %v136_v53 = vld [vmem:[#allocation6 + $0x68] sm:$0xff] }
  0x24   :  { %163 = vmatpush.msra.mxu0 %v146_v16  ;;  %819 = vmatpush.msra.mxu2 %v146_v16  ;;  %v102_v47 = vld [vmem:[#allocation3 + $0x58] sm:$0xff]  ;;  %v135_v49 = vld [vmem:[#allocation6 + $0x60] sm:$0xff]  ;;  %v96_v54 = vld [vmem:[#allocation3 + $0x28] sm:$0xff] }
  0x25   :  { %228 = vmatpush.msra.mxu1 %v114_v17  ;;  %835 = vmatpush.msra.mxu3 %v114_v17  ;;  %v95_v50 = vld [vmem:[#allocation3 + $0x20] sm:$0xff]  ;;  %v104_v55 = vld [vmem:[#allocation3 + $0x68] sm:$0xff]  ;;  %v129_v56 = vld [vmem:[#allocation6 + $0x30] sm:$0xff] }
  0x26   :  { %164 = vmatpush.msra.mxu0 %v145_v18  ;;  %820 = vmatpush.msra.mxu2 %v145_v18  ;;  %v103_v51 = vld [vmem:[#allocation3 + $0x60] sm:$0xff]  ;;  %v137_v57 = vld [vmem:[#allocation6 + $0x70] sm:$0xff]  ;;  %v130_v60 = vld [vmem:[#allocation6 + $0x38] sm:$0xff] }
  0x27   :  { %229 = vmatpush.msra.mxu1 %v113_v19  ;;  %836 = vmatpush.msra.mxu3 %v113_v19  ;;  %v97_v58 = vld [vmem:[#allocation3 + $0x30] sm:$0xff]  ;;  %v138_v61 = vld [vmem:[#allocation6 + $0x78] sm:$0xff]  ;;  %v1106_v1 = vld [vmem:[%s1612_s4] ss:$0 sm:$0xff] }
  0x28   :  { %165 = vmatpush.msra.mxu0 %v144_v20  ;;  %821 = vmatpush.msra.mxu2 %v144_v20  ;;  %v105_v59 = vld [vmem:[#allocation3 + $0x70] sm:$0xff]  ;;  %v98_v62 = vld [vmem:[#allocation3 + $0x38] sm:$0xff]  ;;  %v1112_v5 = vld [vmem:[%s1613_s5] ss:$0 sm:$0xff] }
  0x29   :  { %230 = vmatpush.msra.mxu1 %v112_v21  ;;  %837 = vmatpush.msra.mxu3 %v112_v21  ;;  %v106_v63 = vld [vmem:[#allocation3 + $0x78] sm:$0xff] }
  0x2a   :  { %166 = vmatpush.msra.mxu0 %v143_v22  ;;  %822 = vmatpush.msra.mxu2 %v143_v22 }
  0x2b   :  { %231 = vmatpush.msra.mxu1 %v111_v23  ;;  %838 = vmatpush.msra.mxu3 %v111_v23 }
  0x2c   :  { %167 = vmatpush.msra.mxu0 %v142_v24  ;;  %823 = vmatpush.msra.mxu2 %v142_v24 }
  0x2d   :  { %232 = vmatpush.msra.mxu1 %v110_v25  ;;  %839 = vmatpush.msra.mxu3 %v110_v25 }
  0x2e   :  { %168 = vmatpush.msra.mxu0 %v141_v26  ;;  %824 = vmatpush.msra.mxu2 %v141_v26 }
  0x2f   :  { %233 = vmatpush.msra.mxu1 %v109_v27  ;;  %840 = vmatpush.msra.mxu3 %v109_v27 }
  0x30   :  { %169 = vmatpush.msra.mxu0 %v140_v28  ;;  %825 = vmatpush.msra.mxu2 %v140_v28 }
  0x31   :  { %234 = vmatpush.msra.mxu1 %v108_v29  ;;  %841 = vmatpush.msra.mxu3 %v108_v29 }
  0x32   :  { %170 = vmatpush.msra.mxu0 %v139_v30  ;;  %826 = vmatpush.msra.mxu2 %v139_v30 }
  0x33   :  { %235 = vmatpush.msra.mxu1 %v107_v31  ;;  %842 = vmatpush.msra.mxu3 %v107_v31 }
  0x34   :  { %171 = vmatmul.f32.vlgmr.msra.gmra.mxu0 %v123_v32  ;;  %195 = vmatmul.f32.vlgmr.msra.gmra.mxu2 %v131_v33 }
  0x35   :  { %236 = vmatmul.f32.vlgmr.msra.gmra.mxu1 %v91_v34  ;;  %260 = vmatmul.f32.vlgmr.msra.gmra.mxu3 %v99_v35 }
  0x3c   :  { %174 = vmatmul.f32.gmra.mxu0 %v124_v36  ;;  %198 = vmatmul.f32.gmra.mxu2 %v132_v37 }
  0x3d   :  { %239 = vmatmul.f32.gmra.mxu1 %v92_v38  ;;  %263 = vmatmul.f32.gmra.mxu3 %v100_v39 }
  0x44   :  { %177 = vmatmul.f32.gmra.mxu0 %v125_v40  ;;  %201 = vmatmul.f32.gmra.mxu2 %v133_v41 }
  0x45   :  { %242 = vmatmul.f32.gmra.mxu1 %v93_v42  ;;  %266 = vmatmul.f32.gmra.mxu3 %v101_v43 }
  0x4c   :  { %180 = vmatmul.f32.gmra.mxu0 %v126_v44  ;;  %204 = vmatmul.f32.gmra.mxu2 %v134_v45 }
  0x4d   :  { %245 = vmatmul.f32.gmra.mxu1 %v94_v46  ;;  %269 = vmatmul.f32.gmra.mxu3 %v102_v47 }
  0x54   :  { %183 = vmatmul.f32.gmra.mxu0 %v127_v48  ;;  %207 = vmatmul.f32.gmra.mxu2 %v135_v49 }
  0x55   :  { %248 = vmatmul.f32.gmra.mxu1 %v95_v50  ;;  %272 = vmatmul.f32.gmra.mxu3 %v103_v51 }
  0x5c   :  { %186 = vmatmul.f32.gmra.mxu0 %v128_v52  ;;  %210 = vmatmul.f32.gmra.mxu2 %v136_v53 }
  0x5d   :  { %251 = vmatmul.f32.gmra.mxu1 %v96_v54  ;;  %275 = vmatmul.f32.gmra.mxu3 %v104_v55 }
  0x64   :  { %189 = vmatmul.f32.gmra.mxu0 %v129_v56  ;;  %213 = vmatmul.f32.gmra.mxu2 %v137_v57 }
  0x65   :  { %254 = vmatmul.f32.gmra.mxu1 %v97_v58  ;;  %278 = vmatmul.f32.gmra.mxu3 %v105_v59 }
  0x6c   :  { %192 = vmatmul.f32.gmra.mxu0 %v130_v60  ;;  %216 = vmatmul.f32.gmra.mxu2 %v138_v61 }
  0x6d   :  { %257 = vmatmul.f32.gmra.mxu1 %v98_v62  ;;  %281 = vmatmul.f32.gmra.mxu3 %v106_v63 }
  0xb1   :  { %v172_v0 = vpop.f32.mrf.mxu0 }
  0xb2   :  { %v237_v2 = vpop.f32.mrf.mxu1 }
  0xb3   :  { %v238_v3 = vadd.f32 %v237_v2, %v172_v0 }
  0xb5   :  { %v289_v4 = vadd.f32 %v1106_v1, %v238_v3 }
  0xb7   :  { %v196_v6 = vpop.f32.mrf.mxu2  ;;  %v305_v7 = vmax.f32 %v289_v4, 0.0 }
  0xb8   :  { %v261_v8 = vpop.f32.mrf.mxu3 }
  0xb9   :  { %v262_v9 = vadd.f32 %v261_v8, %v196_v6  ;;  %v175_v10 = vpop.f32.mrf.mxu0  ;;  %v325_v11 = vmul.f32 %v1112_v5, %v305_v7 }
  0xba   :  { %v240_v12 = vpop.f32.mrf.mxu1 }
  0xbb   :  { %v241_v13 = vadd.f32 %v240_v12, %v175_v10  ;;  %341 = vadd.xlane.f32.xlu0 %v325_v11  ;;  %v297_v14 = vadd.f32 %v1106_v1, %v262_v9 }
  0xbd   :  { %v290_v15 = vadd.f32 %v1106_v1, %v241_v13  ;;  %v313_v16 = vmax.f32 %v297_v14, 0.0 }
  0xbf   :  { %v306_v17 = vmax.f32 %v290_v15, 0.0  ;;  %v333_v18 = vmul.f32 %v1112_v5, %v313_v16  ;;  %v199_v19 = vpop.f32.mrf.mxu2 }
  0xc0   :  { %v264_v20 = vpop.f32.mrf.mxu3 }
  0xc1   :  { %357 = vadd.xlane.f32.xlu2 %v333_v18  ;;  %v178_v21 = vpop.f32.mrf.mxu0  ;;  %v265_v22 = vadd.f32 %v264_v20, %v199_v19  ;;  %v326_v23 = vmul.f32 %v1112_v5, %v306_v17 }
  0xc2   :  { %v243_v24 = vpop.f32.mrf.mxu1 }
  0xc3   :  { %v244_v25 = vadd.f32 %v243_v24, %v178_v21  ;;  %v298_v26 = vadd.f32 %v1106_v1, %v265_v22  ;;  %343 = vadd.xlane.f32.xlu0 %v326_v23 }
  0xc5   :  { %v314_v27 = vmax.f32 %v298_v26, 0.0  ;;  %v291_v28 = vadd.f32 %v1106_v1, %v244_v25 }
  0xc7   :  { %v202_v29 = vpop.f32.mrf.mxu2  ;;  %v307_v30 = vmax.f32 %v291_v28, 0.0  ;;  %v334_v31 = vmul.f32 %v1112_v5, %v314_v27 }
  0xc8   :  { %v267_v32 = vpop.f32.mrf.mxu3 }
  0xc9   :  { %v181_v33 = vpop.f32.mrf.mxu0  ;;  %v268_v34 = vadd.f32 %v267_v32, %v202_v29  ;;  %v327_v35 = vmul.f32 %v1112_v5, %v307_v30 }
  0xca   :  { %v246_v36 = vpop.f32.mrf.mxu1 }
  0xcb   :  { %v299_v37 = vadd.f32 %v1106_v1, %v268_v34  ;;  %345 = vadd.xlane.f32.xlu1 %v327_v35  ;;  %359 = vadd.xlane.f32.xlu0 %v334_v31  ;;  %v247_v38 = vadd.f32 %v246_v36, %v181_v33  ;;  %v1148_v36 = vstv %s1614_s6  ;;  %s1050_s6 = smov [#allocation11]  }
  0xcc   :  { %s781_s23 = sshll.u32 %s1050_s6, 4  ;;  %s782_s23 = int_to_ptr.vmem [resolvable:$true] %s781_s23 }
  0xcd   :  { %v315_v39 = vmax.f32 %v299_v37, 0.0  ;;  %v292_v43 = vadd.f32 %v1106_v1, %v247_v38 }
  0xcf   :  { %v205_v40 = vpop.f32.mrf.mxu2  ;;  %v335_v41 = vmul.f32 %v1112_v5, %v315_v39  ;;  %v308_v47 = vmax.f32 %v292_v43, 0.0 }
  0xd0   :  { %v270_v42 = vpop.f32.mrf.mxu3 }
  0xd1   :  { %v184_v44 = vpop.f32.mrf.mxu0  ;;  %v328_v54 = vmul.f32 %v1112_v5, %v308_v47  ;;  %v271_v57 = vadd.f32 %v270_v42, %v205_v40 }
  0xd2   :  { %v249_v45 = vpop.f32.mrf.mxu1 }
  0xd3   :  { %v250_v46 = vadd.f32 %v249_v45, %v184_v44  ;;  %361 = vadd.xlane.f32.xlu1 %v335_v41  ;;  %v300_v62 = vadd.f32 %v1106_v1, %v271_v57 }
  0xd5   :  { %v293_v48 = vadd.f32 %v1106_v1, %v250_v46  ;;  %v316_v7 = vmax.f32 %v300_v62, 0.0 }
  0xd7   :  { %v309_v49 = vmax.f32 %v293_v48, 0.0  ;;  %v208_v50 = vpop.f32.mrf.mxu2  ;;  %v336_v17 = vmul.f32 %v1112_v5, %v316_v7  ;;  %v711_v7 = vlaneseq }
  0xd8   :  { %v273_v51 = vpop.f32.mrf.mxu3 }
  0xd9   :  { %v187_v52 = vpop.f32.mrf.mxu0  ;;  %v329_v53 = vmul.f32 %v1112_v5, %v309_v49  ;;  %v274_v10 = vadd.f32 %v273_v51, %v208_v50 }
  0xda   :  { %v252_v55 = vpop.f32.mrf.mxu1 }
  0xdb   :  { %v253_v56 = vadd.f32 %v252_v55, %v187_v52  ;;  %349 = vadd.xlane.f32.xlu2 %v329_v53  ;;  %347 = vadd.xlane.f32.xlu1 %v328_v54  ;;  %v301_v19 = vadd.f32 %v1106_v1, %v274_v10 }
  0xdd   :  { %v294_v58 = vadd.f32 %v1106_v1, %v253_v56  ;;  %v317_v25 = vmax.f32 %v301_v19, 0.0 }
  0xdf   :  { %v310_v59 = vmax.f32 %v294_v58, 0.0  ;;  %v211_v60 = vpop.f32.mrf.mxu2  ;;  %v337_v32 = vmul.f32 %v1112_v5, %v317_v25 }
  0xe0   :  { %v276_v61 = vpop.f32.mrf.mxu3 }
  0xe1   :  { %v190_v63 = vpop.f32.mrf.mxu0  ;;  %v277_v0 = vadd.f32 %v276_v61, %v211_v60  ;;  %v330_v2 = vmul.f32 %v1112_v5, %v310_v59 }
  0xe2   :  { %v255_v3 = vpop.f32.mrf.mxu1 }
  0xe3   :  { %v256_v4 = vadd.f32 %v255_v3, %v190_v63  ;;  %v302_v6 = vadd.f32 %v1106_v1, %v277_v0  ;;  %351 = vadd.xlane.f32.xlu2 %v330_v2 }
  0xe5   :  { %v295_v8 = vadd.f32 %v1106_v1, %v256_v4  ;;  %v318_v9 = vmax.f32 %v302_v6, 0.0 }
  0xe7   :  { %v311_v11 = vmax.f32 %v295_v8, 0.0  ;;  %v214_v12 = vpop.f32.mrf.mxu2  ;;  %v338_v13 = vmul.f32 %v1112_v5, %v318_v9 }
  0xe8   :  { %v279_v14 = vpop.f32.mrf.mxu3 }
  0xe9   :  { %v193_v15 = vpop.f32.mrf.mxu0  ;;  %v280_v16 = vadd.f32 %v279_v14, %v214_v12  ;;  %v331_v18 = vmul.f32 %v1112_v5, %v311_v11 }
  0xea   :  { %v258_v20 = vpop.f32.mrf.mxu1 }
  0xeb   :  { %v259_v21 = vadd.f32 %v258_v20, %v193_v15  ;;  %v303_v22 = vadd.f32 %v1106_v1, %v280_v16  ;;  %363 = vadd.xlane.f32.xlu2 %v336_v17  ;;  %353 = vadd.xlane.f32.xlu0 %v331_v18  ;;  %v1179_v17 = vand.u32 127, %v711_v7 }
  0xed   :  { %v296_v23 = vadd.f32 %v1106_v1, %v259_v21  ;;  %v319_v24 = vmax.f32 %v303_v22, 0.0 }
  0xef   :  { %v312_v26 = vmax.f32 %v296_v23, 0.0  ;;  %v217_v27 = vpop.f32.mrf.mxu2  ;;  %v339_v28 = vmul.f32 %v1112_v5, %v319_v24  ;;  %v1191_v24 = vadd.s32 4294967232, %v1179_v17 }
  0xf0   :  { %v282_v29 = vpop.f32.mrf.mxu3 }
  0xf1   :  { %v283_v30 = vadd.f32 %v282_v29, %v217_v27  ;;  %v332_v31 = vmul.f32 %v1112_v5, %v312_v26  ;;  %v1194_v26 = vadd.s32 4294967288, %v1179_v17 }
  0xf3   :  { %v304_v33 = vadd.f32 %v1106_v1, %v283_v30  ;;  %369 = vadd.xlane.f32.xlu2 %v339_v28  ;;  %355 = vadd.xlane.f32.xlu1 %v332_v31 }
  0xf4   :  { %365 = vadd.xlane.f32.xlu0 %v337_v32 }
  0xf5   :  { %v320_v34 = vmax.f32 %v304_v33, 0.0 }
  0xf7   :  { %v340_v35 = vmul.f32 %v1112_v5, %v320_v34 }
  0xfb   :  { %367 = vadd.xlane.f32.xlu1 %v338_v13 }
  0xfc   :  { %371 = vadd.xlane.f32.xlu0 %v340_v35 }
 0x12e   :  { %v342_v37 = vpop.xlane.xlu0 %341 }
 0x12f   :  { %v375_v38 = vadd.f32 %v1148_v36, %v342_v37 }
 0x131   :  { %v795_v39 = vmul.f32 -1.442695, %v375_v38 }
 0x133   :  { %852 = vpow2.f32 %v795_v39 }
 0x134   :  { %v358_v40 = vpop.xlane.xlu2 %357 }
 0x135   :  { %v383_v1 = vadd.f32 %v1148_v36, %v358_v40 }
 0x136   :  { %v344_v41 = vpop.xlane.xlu0 %343 }
 0x137   :  { %v803_v42 = vmul.f32 -1.442695, %v383_v1  ;;  %v376_v43 = vadd.f32 %v1148_v36, %v344_v41  ;;  %v1209_v1 = vadd.s32 4294967280, %v1179_v17  ;;  %v1212_v41 = vadd.s32 4294967224, %v1179_v17 }
 0x139   :  { %v853_v5 = vpop.eup %852  ;;  %v796_v44 = vmul.f32 -1.442695, %v376_v43  ;;  %854 = vpow2.f32 %v803_v42 }
 0x13a   :  { %v439_v45 = vadd.f32 1.0, %v853_v5 }
 0x13b   :  { %856 = vpow2.f32 %v796_v44 }
 0x13c   :  { %858 = vrcp.f32 %v439_v45  ;;  %v464_v14 = vand.u32 2147483647, %v439_v45  ;;  %v466_v18 = vand.u32 2147483648, %v439_v45  ;;  %vm460_vm1 = vweird.f32 %v439_v45 }
 0x13e   :  { %v346_v46 = vpop.xlane.xlu1 %345  ;;  %v360_v47 = vpop.xlane.xlu0 %359  ;;  %vm465_vm3 = vcmp.eq.f32.partialorder %v464_v14, 8.507059e+37  ;;  %v467_v30 = vor.u32 1.1754944e-38, %v466_v18 }
 0x13f   :  { %v377_v48 = vadd.f32 %v1148_v36, %v346_v46  ;;  %v384_v49 = vadd.f32 %v1148_v36, %v360_v47  ;;  %v855_v50 = vpop.eup %854 }
 0x140   :  { %v1155_v55 = vadd.f32 1.0, %v855_v50 }
 0x141   :  { %v857_v51 = vpop.eup %856  ;;  %v797_v52 = vmul.f32 -1.442695, %v377_v48  ;;  %v804_v53 = vmul.f32 -1.442695, %v384_v49 }
 0x142   :  { %v859_v54 = vpop.eup %858  ;;  %v1157_v56 = vadd.f32 1.0, %v857_v51  ;;  %v584_v31 = vand.u32 2147483647, %v1155_v55  ;;  %v586_v32 = vand.u32 2147483648, %v1155_v55  ;;  %vm580_vm4 = vweird.f32 %v1155_v55 }
 0x143   :  { %860 = vpow2.f32 %v797_v52  ;;  %v456_v57 = vmul.f32 %v859_v54, %v439_v45  ;;  %vm461_vm0 = vweird.f32 %v859_v54  ;;  %v1221_v45 = vadd.s32 4294967216, %v1179_v17 }
 0x144   :  { %862 = vpow2.f32 %v804_v53  ;;  %vm1186_vm2 = vmor %vm460_vm1, %vm461_vm0  ;;  %v479_v34 = vand.u32 2147483647, %v1157_v56  ;;  %v481_v35 = vand.u32 2147483648, %v1157_v56  ;;  %v587_v44 = vor.u32 1.1754944e-38, %v586_v32 }
 0x145   :  { %864 = vrcp.f32 %v1155_v55  ;;  %v457_v61 = vsub.f32 1.0, %v456_v57  ;;  %vm475_vm5 = vweird.f32 %v1157_v56  ;;  %vm1225_vm6 = vcmp.eq.f32.partialorder %v584_v31, 8.507059e+37 }
 0x146   :  { %v362_v58 = vpop.xlane.xlu1 %361  ;;  %866 = vrcp.f32 %v1157_v56  ;;  %vm1229_vm7 = vcmp.eq.f32.partialorder %v479_v34, 8.507059e+37  ;;  %v482_v49 = vor.u32 1.1754944e-38, %v481_v35  ;;  %v1235_v51 = vadd.s32 4294967264, %v1179_v17 }
 0x147   :  { %v385_v59 = vadd.f32 %v1148_v36, %v362_v58  ;;  %v458_v4 = vmul.f32 %v859_v54, %v457_v61 }
 0x149   :  { %v861_v60 = vpop.eup %860  ;;  %v805_v62 = vmul.f32 -1.442695, %v385_v59  ;;  %v459_v13 = vadd.f32 %v859_v54, %v458_v4 }
 0x14a   :  { %v863_v63 = vpop.eup %862  ;;  %v1162_v0 = vadd.f32 1.0, %v861_v60 }
 0x14b   :  { %868 = vpow2.f32 %v805_v62  ;;  %v1165_v2 = vadd.f32 1.0, %v863_v63  ;;  %v1167_v3 = vpop.eup %864  ;;  %v463_v27 = vsel %vm1186_vm2, %v859_v54, %v459_v13  ;;  %vm720_vm2 = vcmask 195712  }
 0x14c   :  { %870 = vrcp.f32 %v1162_v0  ;;  %v1169_v6 = vpop.eup %866  ;;  %v576_v9 = vmul.f32 %v1167_v3, %v1155_v55  ;;  %v1205_v39 = vsel %vm465_vm3, %v467_v30, %v463_v27  ;;  %vm581_vm8 = vweird.f32 %v1167_v3 }
 0x14d   :  { %872 = vrcp.f32 %v1165_v2  ;;  %v471_v15 = vmul.f32 %v1169_v6, %v1157_v56  ;;  %v713_v53 = vperm.slane %v1205_v39, %v1179_v17  ;;  %vm476_vm9 = vweird.f32 %v1169_v6  ;;  %vm1250_vm10 = vmor %vm580_vm4, %vm581_vm8 }
 0x14e   :  { %v350_v8 = vpop.xlane.xlu2 %349  ;;  %v348_v11 = vpop.xlane.xlu1 %347  ;;  %v577_v25 = vsub.f32 1.0, %v576_v9  ;;  %v494_v61 = vand.u32 2147483647, %v1162_v0  ;;  %v496_v62 = vand.u32 2147483648, %v1162_v0  ;;  %v599_v63 = vand.u32 2147483647, %v1165_v2  ;;  %vm1263_vm13 = vmor %vm475_vm5, %vm476_vm9 }
 0x14f   :  { %v379_v10 = vadd.f32 %v1148_v36, %v350_v8  ;;  %v378_v22 = vadd.f32 %v1148_v36, %v348_v11  ;;  %v472_v28 = vsub.f32 1.0, %v471_v15  ;;  %vm490_vm14 = vweird.f32 %v1162_v0 }
 0x150   :  { %v578_v40 = vmul.f32 %v1167_v3, %v577_v25  ;;  %vm595_vm15 = vweird.f32 %v1165_v2  ;;  %vm1284_vm1 = vcmp.eq.f32.partialorder %v494_v61, 8.507059e+37  ;;  %vm1295_vm3 = vcmp.eq.f32.partialorder %v599_v63, 8.507059e+37 }
 0x151   :  { %v869_v12 = vpop.eup %868  ;;  %v799_v20 = vmul.f32 -1.442695, %v379_v10  ;;  %v798_v38 = vmul.f32 -1.442695, %v378_v22  ;;  %v473_v42 = vmul.f32 %v1169_v6, %v472_v28  ;;  %v1289_v22 = vadd.s32 4294967272, %v1179_v17 }
 0x152   :  { %v1177_v16 = vpop.eup %870  ;;  %v1181_v19 = vadd.f32 1.0, %v869_v12  ;;  %v579_v57 = vadd.f32 %v1167_v3, %v578_v40  ;;  %v601_v12 = vand.u32 2147483648, %v1165_v2  ;;  %v1361_v39 = vadd.s32 4294967256, %v1179_v17 }
 0x153   :  { %v486_v21 = vmul.f32 %v1177_v16, %v1162_v0  ;;  %v1199_v29 = vpop.eup %872  ;;  %v474_v58 = vadd.f32 %v1169_v6, %v473_v42  ;;  %vm491_vm11 = vweird.f32 %v1177_v16 }
 0x154   :  { %874 = vrcp.f32 %v1181_v19  ;;  %v591_v43 = vmul.f32 %v1199_v29, %v1165_v2  ;;  %v583_v14 = vsel %vm1250_vm10, %v1167_v3, %v579_v57  ;;  %vm1280_vm0 = vmor %vm490_vm14, %vm491_vm11  ;;  %v602_v31 = vor.u32 1.1754944e-38, %v601_v12 }
 0x155   :  { %876 = vpow2.f32 %v799_v20  ;;  %v487_v37 = vsub.f32 1.0, %v486_v21  ;;  %v478_v56 = vsel %vm1263_vm13, %v1169_v6, %v474_v58  ;;  %v497_v21 = vor.u32 1.1754944e-38, %v496_v62 }
 0x156   :  { %v352_v33 = vpop.xlane.xlu2 %351  ;;  %878 = vpow2.f32 %v798_v38  ;;  %v592_v59 = vsub.f32 1.0, %v591_v43  ;;  %v1301_v28 = vsel %vm1225_vm6, %v587_v44, %v583_v14  ;;  %v483_v30 = vsel %vm1229_vm7, %v482_v49, %v478_v56 }
 0x157   :  { %v380_v5 = vadd.f32 %v1148_v36, %v352_v33  ;;  %v488_v50 = vmul.f32 %v1177_v16, %v487_v37  ;;  %vm596_vm4 = vweird.f32 %v1199_v29  ;;  %v614_v34 = vand.u32 2147483647, %v1181_v19 }
 0x158   :  { %v593_v15 = vmul.f32 %v1199_v29, %v592_v59  ;;  %v743_v43 = vperm.slane %v1301_v28, %v1191_v24  ;;  %vm1328_vm5 = vmor %vm595_vm15, %vm596_vm4  ;;  %vm610_vm6 = vweird.f32 %v1181_v19  ;;  %vm724_vm14 = vcmask 261312  }
 0x159   :  { %v800_v54 = vmul.f32 -1.442695, %v380_v5  ;;  %v489_v10 = vadd.f32 %v1177_v16, %v488_v50  ;;  %v715_v5 = vperm.slane %v483_v30, %v1194_v26  ;;  %v616_v26 = vand.u32 2147483648, %v1181_v19 }
 0x15a   :  { %v1223_v46 = vpop.eup %874  ;;  %vm1339_vm7 = vcmp.eq.f32.partialorder %v614_v34, 8.507059e+37 }
 0x15b   :  { %v877_v52 = vpop.eup %876  ;;  %880 = vpow2.f32 %v800_v54  ;;  %v606_v11 = vmul.f32 %v1223_v46, %v1181_v19  ;;  %v493_v3 = vsel %vm1280_vm0, %v1177_v16, %v489_v10  ;;  %v594_v16 = vadd.f32 %v1199_v29, %v593_v15 }
 0x15c   :  { %v1243_v60 = vadd.f32 1.0, %v877_v52  ;;  %v879_v8 = vpop.eup %878  ;;  %v498_v37 = vsel %vm1284_vm1, %v497_v21, %v493_v3  ;;  %vm611_vm8 = vweird.f32 %v1223_v46  ;;  %v617_v9 = vor.u32 1.1754944e-38, %v616_v26 }
 0x15d   :  { %v1270_v13 = vadd.f32 1.0, %v879_v8  ;;  %v607_v23 = vsub.f32 1.0, %v606_v11  ;;  %v719_v54 = vperm.slane %v498_v37, %v1209_v1  ;;  %v598_v57 = vsel %vm1328_vm5, %v1199_v29, %v594_v16  ;;  %vm1370_vm9 = vmor %vm610_vm6, %vm611_vm8 }
 0x15e   :  { %v364_v4 = vpop.xlane.xlu2 %363  ;;  %v354_v7 = vpop.xlane.xlu0 %353  ;;  %882 = vrcp.f32 %v1243_v60  ;;  %v717_v1 = vsel %vm716_vm12, %v715_v5, %v713_v53  ;;  %v1355_v8 = vsel %vm1295_vm3, %v602_v31, %v598_v57  ;;  %v524_v3 = vand.u32 2147483647, %v1243_v60 }
 0x15f   :  { %v386_v18 = vadd.f32 %v1148_v36, %v364_v4  ;;  %884 = vrcp.f32 %v1270_v13  ;;  %v381_v32 = vadd.f32 %v1148_v36, %v354_v7  ;;  %v608_v44 = vmul.f32 %v1223_v46, %v607_v23 }
 0x160   :  { %v1366_v56 = vsel %vm720_vm2, %v719_v54, %v717_v1  ;;  %v747_v20 = vperm.slane %v1355_v8, %v1212_v41  ;;  %v526_v19 = vand.u32 2147483648, %v1243_v60  ;;  %vm505_vm11 = vweird.f32 %v1270_v13 }
 0x161   :  { %v806_v25 = vmul.f32 -1.442695, %v386_v18  ;;  %v881_v27 = vpop.eup %880  ;;  %v801_v40 = vmul.f32 -1.442695, %v381_v32  ;;  %v609_v29 = vadd.f32 %v1223_v46, %v608_v44  ;;  %v509_v32 = vand.u32 2147483647, %v1270_v13 }
 0x162   :  { %v1311_v35 = vadd.f32 1.0, %v881_v27  ;;  %vm520_vm13 = vweird.f32 %v1243_v60  ;;  %vm1408_vm0 = vcmp.eq.f32.partialorder %v524_v3, 8.507059e+37  ;;  %vm728_vm3 = vcmask 326912  }
 0x163   :  { %886 = vpow2.f32 %v806_v25  ;;  %v613_v21 = vsel %vm1370_vm9, %v1223_v46, %v609_v29  ;;  %v511_v25 = vand.u32 2147483648, %v1270_v13  ;;  %vm510_vm2 = vcmp.eq.f32.partialorder %v509_v32, 8.507059e+37 }
 0x164   :  { %v1306_v33 = vpop.eup %882  ;;  %888 = vrcp.f32 %v1311_v35  ;;  %v1393_v46 = vsel %vm1339_vm7, %v617_v9, %v613_v21  ;;  %v539_v54 = vand.u32 2147483647, %v1311_v35  ;;  %v541_v57 = vand.u32 2147483648, %v1311_v35 }
 0x165   :  { %v516_v38 = vmul.f32 %v1306_v33, %v1243_v60  ;;  %v1322_v49 = vpop.eup %884  ;;  %890 = vpow2.f32 %v801_v40  ;;  %vm521_vm12 = vweird.f32 %v1306_v33  ;;  %v512_v50 = vor.u32 1.1754944e-38, %v511_v25 }
 0x166   :  { %v370_v42 = vpop.xlane.xlu2 %369  ;;  %v356_v47 = vpop.xlane.xlu1 %355  ;;  %v501_v2 = vmul.f32 %v1322_v49, %v1270_v13  ;;  %vm506_vm10 = vweird.f32 %v1322_v49  ;;  %v527_v13 = vor.u32 1.1754944e-38, %v526_v19  ;;  %vm1423_vm1 = vmor %vm520_vm13, %vm521_vm12  ;;  %vm535_vm5 = vweird.f32 %v1311_v35 }
 0x167   :  { %v366_v48 = vpop.xlane.xlu0 %365  ;;  %v389_v52 = vadd.f32 %v1148_v36, %v370_v42  ;;  %v517_v59 = vsub.f32 1.0, %v516_v38  ;;  %v382_v62 = vadd.f32 %v1148_v36, %v356_v47  ;;  %vm1399_vm15 = vmor %vm505_vm11, %vm506_vm10  ;;  %v1405_v38 = vadd.s32 4294967248, %v1179_v17 }
 0x168   :  { %v387_v63 = vadd.f32 %v1148_v36, %v366_v48  ;;  %v502_v4 = vsub.f32 1.0, %v501_v2  ;;  %v751_v47 = vperm.slane %v1393_v46, %v1221_v45  ;;  %vm732_vm6 = vcmask 392512  }
 0x169   :  { %v809_v61 = vmul.f32 -1.442695, %v389_v52  ;;  %v887_v7 = vpop.eup %886  ;;  %v802_v10 = vmul.f32 -1.442695, %v382_v62  ;;  %v518_v18 = vmul.f32 %v1306_v33, %v517_v59  ;;  %v1442_v62 = vadd.s32 4294967240, %v1179_v17 }
 0x16a   :  { %v1357_v11 = vpop.eup %888  ;;  %v503_v55 = vmul.f32 %v1322_v49, %v502_v4  ;;  %v1363_v53 = vadd.f32 1.0, %v887_v7  ;;  %v807_v12 = vmul.f32 -1.442695, %v387_v63  ;;  %vm1455_vm8 = vcmp.eq.f32.partialorder %v539_v54, 8.507059e+37 }
 0x16b   :  { %892 = vpow2.f32 %v809_v61  ;;  %v891_v14 = vpop.eup %890  ;;  %v531_v0 = vmul.f32 %v1357_v11, %v1311_v35  ;;  %v519_v31 = vadd.f32 %v1306_v33, %v518_v18  ;;  %vm536_vm4 = vweird.f32 %v1357_v11 }
 0x16c   :  { %894 = vpow2.f32 %v802_v10  ;;  %v504_v6 = vadd.f32 %v1322_v49, %v503_v55  ;;  %v1389_v27 = vadd.f32 1.0, %v891_v14  ;;  %vm1451_vm7 = vmor %vm535_vm5, %vm536_vm4  ;;  %v542_v55 = vor.u32 1.1754944e-38, %v541_v57 }
 0x16d   :  { %896 = vrcp.f32 %v1363_v53  ;;  %v532_v23 = vsub.f32 1.0, %v531_v0  ;;  %v1468_v21 = vadd.s32 4294967208, %v1179_v17  ;;  %v629_v19 = vand.u32 2147483647, %v1363_v53 }
 0x16e   :  { %898 = vpow2.f32 %v807_v12  ;;  %v368_v16 = vpop.xlane.xlu1 %367  ;;  %v508_v60 = vsel %vm1399_vm15, %v1322_v49, %v504_v6  ;;  %v523_v49 = vsel %vm1423_vm1, %v1306_v33, %v519_v31  ;;  %v556_v6 = vand.u32 2147483648, %v1389_v27 }
 0x16f   :  { %v533_v37 = vmul.f32 %v1357_v11, %v532_v23  ;;  %900 = vrcp.f32 %v1389_v27  ;;  %v388_v52 = vadd.f32 %v1148_v36, %v368_v16  ;;  %v372_v58 = vpop.xlane.xlu0 %371  ;;  %v513_v59 = vsel %vm510_vm2, %v512_v50, %v508_v60 }
 0x170   :  { %v528_v1 = vsel %vm1408_vm0, %v527_v13, %v523_v49  ;;  %v390_v7 = vadd.f32 %v1148_v36, %v372_v58  ;;  %v723_v9 = vperm.slane %v513_v59, %v1289_v22  ;;  %v631_v36 = vand.u32 2147483648, %v1363_v53 }
 0x171   :  { %v893_v30 = vpop.eup %892  ;;  %v534_v61 = vadd.f32 %v1357_v11, %v533_v37  ;;  %v808_v4 = vmul.f32 -1.442695, %v388_v52  ;;  %v554_v22 = vand.u32 2147483647, %v1389_v27  ;;  %v727_v15 = vperm.slane %v528_v1, %v1235_v51 }
 0x172   :  { %v895_v40 = vpop.eup %894  ;;  %v1415_v5 = vadd.f32 1.0, %v893_v30  ;;  %v725_v25 = vsel %vm724_vm14, %v723_v9, %v1366_v56  ;;  %vm625_vm9 = vweird.f32 %v1363_v53  ;;  %v632_v31 = vor.u32 1.1754944e-38, %v631_v36 }
 0x173   :  { %v1417_v44 = vpop.eup %896  ;;  %v1427_v26 = vadd.f32 1.0, %v895_v40  ;;  %v538_v14 = vsel %vm1451_vm7, %v1357_v11, %v534_v61  ;;  %v810_v11 = vmul.f32 -1.442695, %v390_v7  ;;  %vm736_vm11 = vcmask 458112  }
 0x174   :  { %v899_v2 = vpop.eup %898  ;;  %902 = vrcp.f32 %v1415_v5  ;;  %v621_v33 = vmul.f32 %v1417_v44, %v1363_v53  ;;  %v543_v51 = vsel %vm1455_vm8, %v542_v55, %v538_v14  ;;  %vm550_vm12 = vweird.f32 %v1389_v27 }
 0x175   :  { %904 = vrcp.f32 %v1427_v26  ;;  %v901_v63 = vpop.eup %900  ;;  %v1447_v29 = vadd.f32 1.0, %v899_v2  ;;  %vm1480_vm13 = vcmp.eq.f32.partialorder %v554_v22, 8.507059e+37  ;;  %v729_v42 = vsel %vm728_vm3, %v727_v15, %v725_v25 }
 0x176   :  { %v546_v12 = vmul.f32 %v901_v63, %v1389_v27  ;;  %v622_v18 = vsub.f32 1.0, %v621_v33  ;;  %vm551_vm10 = vweird.f32 %v901_v63  ;;  %v731_v13 = vperm.slane %v543_v51, %v1361_v39 }
 0x177   :  { %906 = vrcp.f32 %v1447_v29  ;;  %vm552_vm14 = vmor %vm550_vm12, %vm551_vm10  ;;  %v557_v27 = vor.u32 1.1754944e-38, %v556_v6  ;;  %vm1492_vm15 = vcmp.eq.f32.partialorder %v629_v19, 8.507059e+37  ;;  %v569_v52 = vand.u32 2147483647, %v1427_v26 }
 0x178   :  { %v547_v0 = vsub.f32 1.0, %v546_v12  ;;  %908 = vpow2.f32 %v808_v4  ;;  %v623_v34 = vmul.f32 %v1417_v44, %v622_v18  ;;  %v571_v49 = vand.u32 2147483648, %v1427_v26 }
 0x179   :  { %910 = vpow2.f32 %v810_v11  ;;  %vm626_vm0 = vweird.f32 %v1417_v44  ;;  %v676_v1 = vand.u32 2147483648, %v1415_v5  ;;  %vm565_vm2 = vweird.f32 %v1427_v26 }
 0x17a   :  { %v1470_v3 = vpop.eup %902  ;;  %v548_v30 = vmul.f32 %v901_v63, %v547_v0  ;;  %v624_v2 = vadd.f32 %v1417_v44, %v623_v34  ;;  %vm670_vm3 = vweird.f32 %v1415_v5  ;;  %vm570_vm5 = vcmp.eq.f32.partialorder %v569_v52, 8.507059e+37 }
 0x17b   :  { %v905_v23 = vpop.eup %904  ;;  %v666_v37 = vmul.f32 %v1470_v3, %v1415_v5  ;;  %v572_v35 = vor.u32 1.1754944e-38, %v571_v49  ;;  %vm740_vm7 = vcmask 523712   ;;  %v646_v15 = vand.u32 2147483648, %v1447_v29 }
 0x17c   :  { %v561_v16 = vmul.f32 %v905_v23, %v1427_v26  ;;  %v549_v56 = vadd.f32 %v901_v63, %v548_v30  ;;  %vm566_vm1 = vweird.f32 %v905_v23  ;;  %vm744_vm8 = vcmask 589312  }
 0x17d   :  { %v1488_v40 = vpop.eup %906  ;;  %v667_v59 = vsub.f32 1.0, %v666_v37  ;;  %vm567_vm4 = vmor %vm565_vm2, %vm566_vm1  ;;  %v677_v0 = vor.u32 1.1754944e-38, %v676_v1  ;;  %v674_v19 = vand.u32 2147483647, %v1415_v5  ;;  %vm671_vm12 = vweird.f32 %v1470_v3 }
 0x17e   :  { %v562_v60 = vsub.f32 1.0, %v561_v16  ;;  %v553_v50 = vsel %vm552_vm14, %v901_v63, %v549_v56  ;;  %v636_v54 = vmul.f32 %v1488_v40, %v1447_v29  ;;  %v909_v57 = vpop.eup %908  ;;  %v733_v63 = vsel %vm732_vm6, %v731_v13, %v729_v42  ;;  %vm1516_vm6 = vmor %vm625_vm9, %vm626_vm0 }
 0x17f   :  { %v558_v39 = vsel %vm1480_vm13, %v557_v27, %v553_v50  ;;  %v1504_v33 = vadd.f32 1.0, %v909_v57  ;;  %v911_v7 = vpop.eup %910  ;;  %v628_v14 = vsel %vm1516_vm6, %v1417_v44, %v624_v2  ;;  %v668_v36 = vmul.f32 %v1470_v3, %v667_v59  ;;  %vm1568_vm1 = vmor %vm670_vm3, %vm671_vm12 }
 0x180   :  { %v563_v58 = vmul.f32 %v905_v23, %v562_v60  ;;  %v637_v61 = vsub.f32 1.0, %v636_v54  ;;  %v735_v9 = vperm.slane %v558_v39, %v1405_v38  ;;  %v644_v38 = vand.u32 2147483647, %v1447_v29 }
 0x181   :  { %912 = vrcp.f32 %v1504_v33  ;;  %v1522_v12 = vadd.f32 1.0, %v911_v7  ;;  %vm640_vm9 = vweird.f32 %v1447_v29  ;;  %v633_v44 = vsel %vm1492_vm15, %v632_v31, %v628_v14 }
 0x182   :  { %v564_v4 = vadd.f32 %v905_v23, %v563_v58  ;;  %v638_v26 = vmul.f32 %v1488_v40, %v637_v61  ;;  %v737_v18 = vsel %vm736_vm11, %v735_v9, %v733_v63  ;;  %vm641_vm10 = vweird.f32 %v1488_v40 }
 0x183   :  { %914 = vrcp.f32 %v1522_v12  ;;  %vm748_vm11 = vcmask 654912   ;;  %vm1543_vm13 = vcmp.eq.f32.partialorder %v644_v38, 8.507059e+37  ;;  %v647_v30 = vor.u32 1.1754944e-38, %v646_v15  ;;  %vm1551_vm14 = vmor %vm640_vm9, %vm641_vm10 }
 0x184   :  { %v568_v55 = vsel %vm567_vm4, %v905_v23, %v564_v4  ;;  %v639_v6 = vadd.f32 %v1488_v40, %v638_v26  ;;  %v669_v23 = vadd.f32 %v1470_v3, %v668_v36  ;;  %v659_v32 = vand.u32 2147483647, %v1504_v33 }
 0x185   :  { %v573_v22 = vsel %vm570_vm5, %v572_v35, %v568_v55  ;;  %v661_v34 = vand.u32 2147483648, %v1504_v33  ;;  %vm1556_vm15 = vcmp.eq.f32.partialorder %v674_v19, 8.507059e+37  ;;  %vm752_vm0 = vcmask 720512  }
 0x186   :  { %v739_v53 = vperm.slane %v573_v22, %v1442_v62  ;;  %v755_v28 = vperm.slane %v633_v44, %v1468_v21  ;;  %v643_v37 = vsel %vm1551_vm14, %v1488_v40, %v639_v6  ;;  %vm756_vm2 = vcmask 786112  }
 0x187   :  { %v913_v11 = vpop.eup %912  ;;  %vm655_vm4 = vweird.f32 %v1504_v33  ;;  %v673_v40 = vsel %vm1568_vm1, %v1470_v3, %v669_v23  ;;  %v758_v13 = vadd.s32 4294967200, %v1179_v17  ;;  %vm1581_vm5 = vcmp.eq.f32.partialorder %v659_v32, 8.507059e+37 }
 0x188   :  { %v741_v62 = vsel %vm740_vm7, %v739_v53, %v737_v18  ;;  %v651_v31 = vmul.f32 %v913_v11, %v1504_v33  ;;  %vm656_vm3 = vweird.f32 %v913_v11  ;;  %vm760_vm6 = vcmask 851712  }
 0x189   :  { %v745_v25 = vsel %vm744_vm8, %v743_v43, %v741_v62  ;;  %v915_v43 = vpop.eup %914  ;;  %v662_v41 = vor.u32 1.1754944e-38, %v661_v34  ;;  %v678_v48 = vsel %vm1556_vm15, %v677_v0, %v673_v40  ;;  %v691_v50 = vand.u32 2147483648, %v1522_v12  ;;  %vm657_vm7 = vmor %vm655_vm4, %vm656_vm3 }
 0x18a   :  { %v652_v56 = vsub.f32 1.0, %v651_v31  ;;  %v749_v42 = vsel %vm748_vm11, %v747_v20, %v745_v25  ;;  %v681_v21 = vmul.f32 %v915_v43, %v1522_v12  ;;  %v648_v20 = vsel %vm1543_vm13, %v647_v30, %v643_v37 }
 0x18b   :  { %v753_v60 = vsel %vm752_vm0, %v751_v47, %v749_v42  ;;  %v762_v52 = vadd.s32 4294967192, %v1179_v17  ;;  %vm686_vm8 = vweird.f32 %v915_v43  ;;  %v689_v54 = vand.u32 2147483647, %v1522_v12 }
 0x18c   :  { %v653_v5 = vmul.f32 %v913_v11, %v652_v56  ;;  %v682_v8 = vsub.f32 1.0, %v681_v21  ;;  %v766_v57 = vadd.s32 4294967184, %v1179_v17  ;;  %vm685_vm9 = vweird.f32 %v1522_v12 }
 0x18d   :  { %v757_v46 = vsel %vm756_vm2, %v755_v28, %v753_v60  ;;  %v759_v47 = vperm.slane %v648_v20, %v758_v13  ;;  %vm764_vm10 = vcmask 917312   ;;  %v770_v2 = vadd.s32 4294967176, %v1179_v17  ;;  %vm687_vm12 = vmor %vm685_vm9, %vm686_vm8 }
 0x18e   :  { %v654_v3 = vadd.f32 %v913_v11, %v653_v5  ;;  %v683_v49 = vmul.f32 %v915_v43, %v682_v8  ;;  %v692_v59 = vor.u32 1.1754944e-38, %v691_v50  ;;  %vm768_vm11 = vcmask 982912  }
 0x18f   :  { %vm690_vm13 = vcmp.eq.f32.partialorder %v689_v54, 8.507059e+37  ;;  %v761_v63 = vsel %vm760_vm6, %v759_v47, %v757_v46  ;;  %v767_v1 = vperm.slane %v678_v48, %v766_v57  ;;  %vm772_vm14 = vcmask 1048512  }
 0x190   :  { %v658_v45 = vsel %vm657_vm7, %v913_v11, %v654_v3  ;;  %v684_v58 = vadd.f32 %v915_v43, %v683_v49 }
 0x191   :  { %v663_v39 = vsel %vm1581_vm5, %v662_v41, %v658_v45 }
 0x192   :  { %v763_v61 = vperm.slane %v663_v39, %v762_v52  ;;  %v688_v33 = vsel %vm687_vm12, %v915_v43, %v684_v58 }
 0x193   :  { %v693_v4 = vsel %vm690_vm13, %v692_v59, %v688_v33 }
 0x194   :  { %v765_v7 = vsel %vm764_vm10, %v763_v61, %v761_v63  ;;  %v771_v17 = vperm.slane %v693_v4, %v770_v2 }
 0x195   :  { %v769_v9 = vsel %vm768_vm11, %v767_v1, %v765_v7 }
 0x196   :  { %v773_v35 = vsel %vm772_vm14, %v771_v17, %v769_v9 }
 0x197   :  { %775 = vst [vmem:[#allocation11] sm:$0x1] %v773_v35 }
 0x198   :  { %786 = dma.vmem_to_hbm [thread:$0]  %s782_s23, 16, %s784_s26, [#allocation5]  }
 0x199   :  { %1042 = dma.done.wait [#allocation5], 16  }
 0x19a   :  { %1043 = vsyncadd [#allocation5], 4294967280 }
 0x19b   :  { %791 = vsyncpa [#allocation4], 1 }
 0x19c   :  { %792 = vsyncpa [#allocation7], 1 }
 0x19d   :  { %793 = vsyncpa [#allocation10], 1 }
 0x19e   :  { %794 = vsyncpa [#allocation5], 1 }

</bundles_post_ra>
